<compile_context>
chip_gen: v7x
topology: tpu7x:2x2x1
jax: 0.10.0
libtpu: 0.0.40
codegen_flags: <defaults>
</compile_context>

<pallas_src>
import functools

import jax
import jax.numpy as jnp
from jax import lax
from jax.experimental import pallas as pl
from jax.experimental.pallas import tpu as pltpu


def focal_loss_kernel(logits_ref, targets_ref, out_ref, acc_ref, *,
                      alpha, gamma, n_total, tile_n):
    i = pl.program_id(0)
    num_tiles = pl.num_programs(0)

    # ---- init the persistent per-row CE accumulator on the first tile ----
    @pl.when(i == 0)
    def _init():
        acc_ref[...] = jnp.zeros_like(acc_ref)

    x = logits_ref[...].astype(jnp.float32)          # (TILE_N, C), f32 compute
    tgt = targets_ref[...]                           # (TILE_N, 1) int32
    tn, c = x.shape

    # ---- numerically-stable log-sum-exp per row ----
    m = jnp.max(x, axis=-1, keepdims=True)                               # (TILE_N, 1)
    lse = m + jnp.log(jnp.sum(jnp.exp(x - m), axis=-1, keepdims=True))   # (TILE_N, 1)

    # gather the target-class logit via a one-hot lane mask + lane reduce
    class_ids = lax.broadcasted_iota(jnp.int32, (tn, c), 1)              # (TILE_N, C)
    tgt_logit = jnp.sum(jnp.where(class_ids == tgt, x, 0.0),
                        axis=-1, keepdims=True)                          # (TILE_N, 1)

    ce_per_sample = lse - tgt_logit                                      # (TILE_N, 1)

    # mask out padded rows of a ragged last tile (select -> no NaN leak)
    row_ids = i * tile_n + lax.broadcasted_iota(jnp.int32, (tn, 1), 0)
    valid = row_ids < n_total
    acc_ref[...] += jnp.where(valid, ce_per_sample, 0.0)

    # ---- epilogue: batch mean + focal transform, only on the last tile ----
    @pl.when(i == num_tiles - 1)
    def _finalize():
        ce = jnp.sum(acc_ref[...]) / jnp.float32(n_total)
        t = 1.0 - jnp.exp(-ce)
        if float(gamma) == int(gamma) and int(gamma) >= 0:
            focal_factor = t ** int(gamma)       # integer_pow -> pure multiplies
        else:
            focal_factor = t ** jnp.float32(gamma)
        out_ref[...] = jnp.full((1, 1), alpha * focal_factor * ce,
                                dtype=out_ref.dtype)


def _choose_tile_n(n, c, itemsize):
    """Pick a batch-tile size: ~4 MiB per (double-buffered) logits buffer."""
    target_bytes = 4 * 1024 * 1024
    c_padded = max(c, 128)                 # lanes pad to 128 in VMEM
    rows = target_bytes // (c_padded * itemsize)
    rows = max(32, min(int(rows), 2048))
    rows = (rows // 32) * 32               # safe sublane multiple for f32/bf16/int8
    if n <= rows:
        return n                           # single full-extent block (always legal)
    return rows


def focal_loss(logits, targets, alpha=1.0, gamma=2.0, tile_n=None):
    """logits: (N, C) float32/bfloat16; targets: (N,) int class ids. Returns scalar."""
    n, c = logits.shape
    targets2d = targets.astype(jnp.int32).reshape(n, 1)

    if tile_n is None:
        tile_n = _choose_tile_n(n, c, jnp.dtype(logits.dtype).itemsize)
    num_tiles = pl.cdiv(n, tile_n)

    kernel = functools.partial(
        focal_loss_kernel,
        alpha=float(alpha),
        gamma=float(gamma),
        n_total=n,
        tile_n=tile_n,
    )

    out = pl.pallas_call(
        kernel,
        out_shape=jax.ShapeDtypeStruct((1, 1), jnp.float32),
        grid_spec=pltpu.PrefetchScalarGridSpec(
            num_scalar_prefetch=0,
            grid=(num_tiles,),
            in_specs=[
                pl.BlockSpec((tile_n, c), lambda i: (i, 0)),   # logits tile
                pl.BlockSpec((tile_n, 1), lambda i: (i, 0)),   # target ids tile
            ],
            out_specs=pl.BlockSpec((1, 1), lambda i: (0, 0)),  # resident scalar
            scratch_shapes=[pltpu.VMEM((tile_n, 1), jnp.float32)],
        ),
        compiler_params=pltpu.CompilerParams(
            dimension_semantics=("arbitrary",),   # reduction axis over N tiles
            vmem_limit_bytes=32 * 1024 * 1024,    # safe on v5e/v6e/v7x
        ),
    )(logits, targets2d)
    return out[0, 0]


def _focal_loss_ref(logits, targets, alpha=1.0, gamma=2.0):
    # pure-JAX reference for correctness checking
    logp = jax.nn.log_softmax(logits.astype(jnp.float32), axis=-1)
    ce = -jnp.mean(jnp.take_along_axis(logp, targets[:, None], axis=-1))
    return alpha * (1.0 - jnp.exp(-ce)) ** gamma * ce


if __name__ == "__main__":
    key = jax.random.PRNGKey(0)
    k1, k2, k3, k4 = jax.random.split(key, 4)

    # --- small sanity case (single tile) ---
    N, C = 8, 32
    logits = jax.random.normal(k1, (N, C), dtype=jnp.float32)
    targets = jax.random.randint(k2, (N,), 0, C, dtype=jnp.int32)
    loss = focal_loss(logits, targets, alpha=1.0, gamma=2.0)
    jax.block_until_ready(loss)
    ref = _focal_loss_ref(logits, targets, alpha=1.0, gamma=2.0)
    assert jnp.allclose(loss, ref, rtol=1e-5, atol=1e-5), (loss, ref)

    # --- multi-tile grid with a ragged last tile (exercises accumulator path) ---
    N2, C2 = 200, 32
    logits2 = jax.random.normal(k3, (N2, C2), dtype=jnp.float32)
    targets2 = jax.random.randint(k4, (N2,), 0, C2, dtype=jnp.int32)
    loss2 = focal_loss(logits2, targets2, tile_n=64)   # 4 tiles, last is ragged
    jax.block_until_ready(loss2)
    ref2 = _focal_loss_ref(logits2, targets2)
    assert jnp.allclose(loss2, ref2, rtol=1e-5, atol=1e-5), (loss2, ref2)

    # --- bf16 logits path (half HBM bytes; f32 compute inside the kernel) ---
    logits2_bf16 = logits2.astype(jnp.bfloat16)
    loss3 = focal_loss(logits2_bf16, targets2, tile_n=64)
    jax.block_until_ready(loss3)
    ref3 = _focal_loss_ref(logits2_bf16.astype(jnp.float32), targets2)
    assert jnp.allclose(loss3, ref3, rtol=5e-2, atol=5e-2), (loss3, ref3)

    print("KERNEL_OK")
</pallas_src>

<mosaic_0001>
module attributes {stable_mosaic.version = 11 : i64} {
  func.func @focal_loss_kernel(%arg0: i32, %arg1: memref<8x32xf32, #tpu.memory_space<vmem>>, %arg2: memref<8x1xi32, #tpu.memory_space<vmem>>, %arg3: memref<1x1xf32, #tpu.memory_space<vmem>>, %arg4: memref<8x1xf32, #tpu.memory_space<vmem>>) attributes {dimension_semantics = [#tpu.dimension_semantics<arbitrary>], iteration_bounds = array<i64: 1>, scalar_prefetch = 0 : i64, scratch_operands = 1 : i64, tpu.core_type = #tpu.core_type<tc>, window_params = [{transform_indices = @transform_0, window_bounds = array<i64: 8, 32>}, {transform_indices = @transform_1, window_bounds = array<i64: 8, 1>}, {pipeline_mode = #tpu.pipeline_mode<synchronous>, transform_indices = @transform_2, window_bounds = array<i64: 1, 1>}]} {
    %c0_i32 = arith.constant 0 : i32
    %0 = arith.cmpi eq, %arg0, %c0_i32 : i32
    %1 = arith.extui %0 : i1 to i32
    %c0_i32_0 = arith.constant 0 : i32
    %2 = arith.cmpi ne, %1, %c0_i32_0 : i32
    scf.if %2 {
      %cst_15 = arith.constant 0.000000e+00 : f32
      %36 = vector.broadcast %cst_15 : f32 to vector<8x1xf32>
      %c0_16 = arith.constant 0 : index
      %c0_17 = arith.constant 0 : index
      %37 = vector.load %arg4[%c0_16, %c0_17] : memref<8x1xf32, #tpu.memory_space<vmem>>, vector<8x1xf32>
      tpu.vector_store %arg4[%c0_16, %c0_17], %36 {strides = array<i32>} : memref<8x1xf32, #tpu.memory_space<vmem>>, vector<8x1xf32>,
    } else {
    }
    %c0 = arith.constant 0 : index
    %c0_1 = arith.constant 0 : index
    %3 = vector.load %arg1[%c0, %c0_1] : memref<8x32xf32, #tpu.memory_space<vmem>>, vector<8x32xf32>
    %c0_2 = arith.constant 0 : index
    %c0_3 = arith.constant 0 : index
    %4 = vector.load %arg2[%c0_2, %c0_3] : memref<8x1xi32, #tpu.memory_space<vmem>>, vector<8x1xi32>
    %cst = arith.constant dense<0xFF800000> : vector<8xf32>
    %5 = vector.multi_reduction <maximumf>, %3, %cst [1] : vector<8x32xf32> to vector<8xf32>
    %6 = vector.shape_cast %5 : vector<8xf32> to vector<8x1xf32>
    %7 = vector.broadcast %6 : vector<8x1xf32> to vector<8x32xf32>
    %8 = arith.subf %3, %7 : vector<8x32xf32>
    %9 = math.exp %8 : vector<8x32xf32>
    %cst_4 = arith.constant dense<0.000000e+00> : vector<8xf32>
    %10 = vector.multi_reduction <add>, %9, %cst_4 [1] : vector<8x32xf32> to vector<8xf32>
    %11 = vector.shape_cast %10 : vector<8xf32> to vector<8x1xf32>
    %12 = math.log %11 : vector<8x1xf32>
    %13 = arith.addf %6, %12 : vector<8x1xf32>
    %14 = tpu.iota {dimensions = array<i32: 1>} : vector<8x32xi32>
    %15 = vector.broadcast %4 : vector<8x1xi32> to vector<8x32xi32>
    %16 = arith.cmpi eq, %14, %15 : vector<8x32xi32>
    %cst_5 = arith.constant 0.000000e+00 : f32
    %17 = vector.broadcast %cst_5 : f32 to vector<8x32xf32>
    %18 = arith.select %16, %3, %17 : vector<8x32xi1>, vector<8x32xf32>
    %cst_6 = arith.constant dense<0.000000e+00> : vector<8xf32>
    %19 = vector.multi_reduction <add>, %18, %cst_6 [1] : vector<8x32xf32> to vector<8xf32>
    %20 = vector.shape_cast %19 : vector<8xf32> to vector<8x1xf32>
    %21 = arith.subf %13, %20 : vector<8x1xf32>
    %c8_i32 = arith.constant 8 : i32
    %22 = arith.muli %arg0, %c8_i32 : i32
    %23 = tpu.iota {dimensions = array<i32: 0>} : vector<8x1xi32>
    %24 = vector.broadcast %22 : i32 to vector<8x1xi32>
    %25 = arith.addi %24, %23 : vector<8x1xi32>
    %c8_i32_7 = arith.constant 8 : i32
    %26 = vector.broadcast %c8_i32_7 : i32 to vector<8x1xi32>
    %27 = arith.cmpi slt, %25, %26 : vector<8x1xi32>
    %c0_8 = arith.constant 0 : index
    %c0_9 = arith.constant 0 : index
    %28 = vector.load %arg4[%c0_8, %c0_9] : memref<8x1xf32, #tpu.memory_space<vmem>>, vector<8x1xf32>
    %cst_10 = arith.constant 0.000000e+00 : f32
    %29 = vector.broadcast %cst_10 : f32 to vector<8x1xf32>
    %30 = arith.select %27, %21, %29 : vector<8x1xi1>, vector<8x1xf32>
    %31 = arith.addf %28, %30 : vector<8x1xf32>
    %c0_11 = arith.constant 0 : index
    %c0_12 = arith.constant 0 : index
    %32 = vector.load %arg4[%c0_11, %c0_12] : memref<8x1xf32, #tpu.memory_space<vmem>>, vector<8x1xf32>
    tpu.vector_store %arg4[%c0_11, %c0_12], %31 {strides = array<i32>} : memref<8x1xf32, #tpu.memory_space<vmem>>, vector<8x1xf32>,
    %c0_i32_13 = arith.constant 0 : i32
    %33 = arith.cmpi eq, %arg0, %c0_i32_13 : i32
    %34 = arith.extui %33 : i1 to i32
    %c0_i32_14 = arith.constant 0 : i32
    %35 = arith.cmpi ne, %34, %c0_i32_14 : i32
    scf.if %35 {
      %c0_15 = arith.constant 0 : index
      %c0_16 = arith.constant 0 : index
      %36 = vector.load %arg4[%c0_15, %c0_16] : memref<8x1xf32, #tpu.memory_space<vmem>>, vector<8x1xf32>
      %37 = vector.shape_cast %36 : vector<8x1xf32> to vector<1x8x1xf32>
      %cst_17 = arith.constant dense<0.000000e+00> : vector<1xf32>
      %38 = vector.multi_reduction <add>, %37, %cst_17 [1, 2] : vector<1x8x1xf32> to vector<1xf32>
      %39 = vector.shape_cast %38 : vector<1xf32> to vector<1x1x1xf32>
      %40 = vector.extract %39[0, 0, 0] : f32 from vector<1x1x1xf32>
      %cst_18 = arith.constant 8.000000e+00 : f32
      %41 = arith.divf %40, %cst_18 : f32
      %cst_19 = arith.constant 0.000000e+00 : f32
      %42 = arith.subf %cst_19, %41 : f32
      %43 = math.exp %42 : f32
      %cst_20 = arith.constant 1.000000e+00 : f32
      %44 = arith.subf %cst_20, %43 : f32
      %45 = arith.mulf %44, %44 : f32
      %cst_21 = arith.constant 1.000000e+00 : f32
      %46 = arith.mulf %cst_21, %45 : f32
      %47 = arith.mulf %46, %41 : f32
      %48 = vector.broadcast %47 : f32 to vector<1x1xf32>
      %c0_22 = arith.constant 0 : index
      %c0_23 = arith.constant 0 : index
      %49 = vector.load %arg3[%c0_22, %c0_23] : memref<1x1xf32, #tpu.memory_space<vmem>>, vector<1x1xf32>
      tpu.vector_store %arg3[%c0_22, %c0_23], %48 {strides = array<i32>} : memref<1x1xf32, #tpu.memory_space<vmem>>, vector<1x1xf32>,
    } else {
    }
    return
  }
  func.func @transform_0(%arg0: i32) -> (i32, i32) {
    %c0_i32 = arith.constant 0 : i32
    %c0_i32_0 = arith.constant 0 : i32
    return %arg0, %c0_i32 : i32, i32
  }
  func.func @transform_1(%arg0: i32) -> (i32, i32) {
    %c0_i32 = arith.constant 0 : i32
    %c0_i32_0 = arith.constant 0 : i32
    return %arg0, %c0_i32 : i32, i32
  }
  func.func @transform_2(%arg0: i32) -> (i32, i32) {
    %c0_i32 = arith.constant 0 : i32
    %c0_i32_0 = arith.constant 0 : i32
    %c0_i32_1 = arith.constant 0 : i32
    return %c0_i32, %c0_i32_0 : i32, i32
  }
}

</mosaic_0001>

<bundles_post_ra>
// kernel: tpu_custom_call.1
= control target key start
LH: loop header
LB: loop body
LE: loop exit
PB: predicated region body
PF: predicated region fallthrough
CT: control target
= control target key end

     0   :  { %vm20_vm0 = vcmask 261120   ;;  %s174_s0 = inlined_call_operand.vmem [shape: f32[8,32], index: 0, kind: input, shape index: {}]   ;;  %s175_s1 = inlined_call_operand.vmem [shape: s32[8,1], index: 1, kind: input, shape index: {}]   ;;  %s176_s2 = inlined_call_operand.hbm [shape: f32[1,1], index: 2, kind: output, shape index: {}]  }
   0x1   :  { %v18_v0 = vld [vmem:[%s174_s0] sm:$0xff] }
   0x2   :  { %7 = vsyncpa [#allocation4], 0  ;;  %v21_v1 = vsel %vm20_vm0, %v18_v0, -inf  ;;  %v135_v2 = vmov 0   ;;  %v19_v3 = vld [vmem:[%s175_s1] sm:$0xff]  ;;  %v33_v7 = vlaneseq  ;;  %vm16_vm2 = vcmask 7168  }
   0x3   :  { %104 = vset.pattern.permute.xlu0 %v135_v2  ;;  %v136_v14 = vmov 0.0   ;;  %s137_s17 = smov [#allocation3]   ;;  %vm81_vm3 = vcmask 0  }
   0x4   :  { %22 = vmax.xlane.f32.xlu0 %v21_v1  ;;  %v34_v8 = vand.u32 127, %v33_v7  ;;  %17 = vst.msk [vmem:[#allocation2] sm:$0xff] %vm16_vm2, %v136_v14  ;;  %s89_s18 = sshll.u32 %s137_s17, 4  ;;  %s90_s18 = int_to_ptr.vmem [resolvable:$true] %s89_s18 }
   0x5   :  { %s111_s20 = scalar_lea.vmem %s90_s18, 16  ;;  %s115_s21 = scalar_lea.vmem %s90_s18, 32 }
   0x6   :  { %p112_p0 = scmp.ne.s32.totalorder %s90_s18, %s111_s20  ;;  %p116_p1 = scmp.lt.s32.totalorder %s90_s18, %s90_s18 }
   0x7   :  { %p117_p2 = scmp.lt.s32.totalorder %s115_s21, %s111_s20 }
   0x9   :  { %p118_p3 = por %p117_p2, %p116_p1 }
   0xb   :  { %v50_v20 = vld [vmem:[#allocation2] sm:$0xff]  ;;  %p119_p4 = pnand %p118_p3, %p112_p0 }
  0x1a   :  { %36 = vperm.xlu0 %104, %v19_v3  }
  0x91   :  { %v23_v4 = vpop.xlane.xlu0 %22 }
  0x92   :  { %v24_v5 = vsub.f32 %v18_v0, %v23_v4 }
  0x94   :  { %v25_v6 = vmul.f32 1.442695, %v24_v5 }
  0x96   :  { %105 = vpow2.f32 %v25_v6 }
  0x99   :  { %v37_v9 = vpop.permute.xlu0 %36 }
  0x9a   :  { %vm38_vm1 = vcmp.eq.s32.totalorder %v34_v8, %v37_v9 }
  0x9b   :  { %v39_v11 = vsel %vm38_vm1, %v18_v0, 0.0 }
  0x9c   :  { %v40_v13 = vsel %vm20_vm0, %v39_v11, 0.0 }
  0xa0   :  { %v106_v10 = vpop.eup %105 }
  0xa1   :  { %v27_v12 = vsel %vm20_vm0, %v106_v10, 0.0 }
  0xa2   :  { %28 = vadd.xlane.f32.xlu1 %v27_v12 }
  0xa6   :  { %41 = vadd.xlane.f32.xlu1 %v40_v13 }
 0x12f   :  { %v29_v15 = vpop.xlane.xlu1 %28 }
 0x130   :  { %107 = vlog2.f32 %v29_v15 }
 0x133   :  { %v42_v18 = vpop.xlane.xlu1 %41 }
 0x13a   :  { %v108_v16 = vpop.eup %107 }
 0x13b   :  { %v31_v17 = vmul.f32 0.6931472, %v108_v16 }
 0x13d   :  { %v32_v19 = vadd.f32 %v31_v17, %v23_v4 }
 0x13f   :  { %v43_v21 = vsub.f32 %v32_v19, %v42_v18 }
 0x141   :  { %v52_v22 = vadd.f32 %v50_v20, %v43_v21 }
 0x143   :  { %54 = vst.msk [vmem:[#allocation2] sm:$0xff] %vm16_vm2, %v52_v22 }
 0x14a   :  { %v58_v23 = vld [vmem:[#allocation2] sm:$0xff] }
 0x14b   :  { %v59_v24 = vsel %vm16_vm2, %v58_v23, 0.0 }
 0x14c   :  { %60 = vadd.xlane.f32.xlu1 %v59_v24 }
 0x1d9   :  { %v61_v25 = vpop.xlane.xlu1 %60 }
 0x1da   :  { %v62_v26 = vrot.slane %v61_v25, 4 }
 0x1dc   :  { %v63_v27 = vadd.f32 %v62_v26, %v61_v25 }
 0x1de   :  { %v64_v28 = vrot.slane %v63_v27, 2 }
 0x1e0   :  { %v65_v29 = vadd.f32 %v64_v28, %v63_v27 }
 0x1e2   :  { %v66_v30 = vrot.slane %v65_v29, 1 }
 0x1e4   :  { %v67_v31 = vadd.f32 %v66_v30, %v65_v29 }
 0x1e6   :  { %97 = vpush %v67_v31 }
 0x217   :  { %s98_s0 = spop %97 }
 0x218   :  { %s71_s1 = smul.f32 0.125, %s98_s0 }
 0x21a   :  { %s72_s13 = ssub.f32 0.0, %s71_s1 }
 0x21c   :  { %v73_v32 = vstv %s72_s13 }
 0x21d   :  { %v74_v33 = vmul.f32 1.442695, %v73_v32 }
 0x21f   :  { %109 = vpow2.f32 %v74_v33 }
 0x229   :  { %v110_v34 = vpop.eup %109 }
 0x22a   :  { %99 = vpush %v110_v34 }
 0x25b   :  { %s100_s14 = spop %99 }
 0x25c   :  { %s77_s15 = ssub.f32 1.0, %s100_s14 }
 0x25e   :  { %s78_s16 = smul.f32 %s77_s15, %s77_s15 }
 0x260   :  { %s79_s19 = smul.f32 %s78_s16, %s71_s1 }
 0x262   :  { %v80_v35 = vstv %s79_s19 }
 0x263   :  { %82 = vst.msk [vmem:[#allocation3] sm:$0x1] %vm81_vm3, %v80_v35 }
 0x264   :  { %122 = shalt.err (!%p119_p4)
}
 0x265   :  { %s123_s24 = scalar_lea.hbm %s176_s2, 16 }
 0x266   :  { %p124_p5 = scmp.ne.s32.totalorder %s176_s2, %s123_s24  ;;  %p127_p6 = scmp.lt.u32.totalorder %s123_s24, %s176_s2 }
 0x268   :  { %p129_p7 = pnand %p127_p6, %p124_p5 }
 0x26a   :  { %132 = shalt.err (!%p129_p7)
}
 0x26b   :  { %92 = dma.vmem_to_hbm [thread:$0]  %s90_s18, 16, %s176_s2, [#allocation4]  }
 0x26c   :  { %133 = dma.done.wait [#allocation4], 16  }
 0x26d   :  { %134 = vsyncadd [#allocation4], 4294967280 }
 0x26e   :  { %96 = vsyncpa [#allocation4], 1 }

</bundles_post_ra>
